<compile_context>
chip_gen: v5e
topology: v5e:2x2
jax: 0.10.0
libtpu: 0.0.40
codegen_flags: <defaults>
</compile_context>

<pallas_src>
import jax
import jax.numpy as jnp
from jax.experimental import pallas as pl
from jax.experimental.pallas import tpu as pltpu


def encoder_kernel(x_ref, label_ref,
                   w1x_ref, w1l_ref,
                   w23_ref, b123_ref,
                   whead_ref, bhead_ref,
                   out_ref):
    # Linear(inp_size, hidden) + ReLU, with the input concat folded into a
    # split matmul (no lane-axis concat / relayout copy inside the kernel).
    h = (jnp.dot(x_ref[...], w1x_ref[...], preferred_element_type=jnp.float32)
         + jnp.dot(label_ref[...], w1l_ref[...], preferred_element_type=jnp.float32)
         + b123_ref[0])
    h = jnp.maximum(h, 0.0)

    # Linear(hidden, hidden) + ReLU
    h = jnp.dot(h, w23_ref[0], preferred_element_type=jnp.float32) + b123_ref[1]
    h = jnp.maximum(h, 0.0)

    # Dropout(0.3): identity at inference.

    # Linear(hidden, hidden) + ReLU
    h = jnp.dot(h, w23_ref[1], preferred_element_type=jnp.float32) + b123_ref[2]
    h = jnp.maximum(h, 0.0)

    # Fused mean|var head: one matmul, one lane-denser [B, 2*latent] store.
    out_ref[...] = (jnp.dot(h, whead_ref[...], preferred_element_type=jnp.float32)
                    + bhead_ref[...])


def encoder_forward(x, label, params):
    """x: [B, X], label: [B, L] -> (mean [B, latent], var [B, latent])."""
    B = x.shape[0]
    latent_size = params["whead"].shape[1] // 2

    operands = (
        x, label,
        params["w1x"], params["w1l"],
        params["w23"], params["b123"],
        params["whead"], params["bhead"],
    )

    # Full-array blocks resident in VMEM (shapes are tiny); single grid point.
    out = pl.pallas_call(
        encoder_kernel,
        out_shape=jax.ShapeDtypeStruct((B, 2 * latent_size), jnp.float32),
        in_specs=[pl.BlockSpec(memory_space=pltpu.VMEM) for _ in operands],
        out_specs=pl.BlockSpec(memory_space=pltpu.VMEM),
    )(*operands)

    # Cheap XLA slice on the fused head output.
    return out[:, :latent_size], out[:, latent_size:]


def init_params(key, x_size, label_size, hidden_size, latent_size):
    """Deterministic torch-style init, then repack for the kernel layout."""
    inp_size = x_size + label_size
    keys = jax.random.split(key, 10)

    def linear(kw, kb, fan_in, fan_out):
        # torch.nn.Linear default: U(-1/sqrt(fan_in), 1/sqrt(fan_in))
        bound = 1.0 / jnp.sqrt(jnp.float32(fan_in))
        w = jax.random.uniform(kw, (fan_in, fan_out), jnp.float32, -bound, bound)
        b = jax.random.uniform(kb, (fan_out,), jnp.float32, -bound, bound)
        return w, b

    w1, b1 = linear(keys[0], keys[1], inp_size, hidden_size)
    w2, b2 = linear(keys[2], keys[3], hidden_size, hidden_size)
    w3, b3 = linear(keys[4], keys[5], hidden_size, hidden_size)
    wm, bm = linear(keys[6], keys[7], hidden_size, latent_size)
    wv, bv = linear(keys[8], keys[9], hidden_size, latent_size)

    return dict(
        # First layer pre-split so the kernel never concatenates inputs.
        w1x=w1[:x_size, :],                      # [X, H]
        w1l=w1[x_size:, :],                      # [L, H]
        # Stacked same-shape weights / biases -> fewer operand DMAs.
        w23=jnp.stack([w2, w3], axis=0),         # [2, H, H]
        b123=jnp.stack([b1, b2, b3], axis=0),    # [3, H]
        # Fused mean|var head.
        whead=jnp.concatenate([wm, wv], axis=1),             # [H, 2*latent]
        bhead=jnp.concatenate([bm, bv], axis=0)[None, :],    # [1, 2*latent]
    )


def encoder_reference(x, label, params):
    """Pure-JAX reference of the PyTorch forward (eval mode)."""
    h = jnp.maximum(x @ params["w1x"] + label @ params["w1l"] + params["b123"][0], 0.0)
    h = jnp.maximum(h @ params["w23"][0] + params["b123"][1], 0.0)
    h = jnp.maximum(h @ params["w23"][1] + params["b123"][2], 0.0)
    out = h @ params["whead"] + params["bhead"]
    latent = params["whead"].shape[1] // 2
    return out[:, :latent], out[:, latent:]


if __name__ == "__main__":
    # Small shapes: batch=8, x_dim=24, label_dim=8 -> inp_size=32,
    # hidden_size=32, latent_size=16.
    B, X_DIM, LABEL_DIM = 8, 24, 8
    HIDDEN_SIZE = 32
    LATENT_SIZE = 16

    key = jax.random.PRNGKey(0)
    k_x, k_lbl, k_params = jax.random.split(key, 3)

    x = jax.random.normal(k_x, (B, X_DIM), jnp.float32)
    label = jax.random.normal(k_lbl, (B, LABEL_DIM), jnp.float32)
    params = init_params(k_params, X_DIM, LABEL_DIM, HIDDEN_SIZE, LATENT_SIZE)

    mean, var = encoder_forward(x, label, params)
    jax.block_until_ready((mean, var))

    mean_ref, var_ref = encoder_reference(x, label, params)
    assert mean.shape == (B, LATENT_SIZE) and var.shape == (B, LATENT_SIZE)
    assert jnp.allclose(mean, mean_ref, atol=1e-5, rtol=1e-5)
    assert jnp.allclose(var, var_ref, atol=1e-5, rtol=1e-5)

    print("KERNEL_OK")
</pallas_src>

<mosaic_0001>
module attributes {stable_mosaic.version = 11 : i64} {
  func.func @encoder_kernel(%arg0: memref<8x24xf32, #tpu.memory_space<vmem>>, %arg1: memref<8x8xf32, #tpu.memory_space<vmem>>, %arg2: memref<24x32xf32, #tpu.memory_space<vmem>>, %arg3: memref<8x32xf32, #tpu.memory_space<vmem>>, %arg4: memref<2x32x32xf32, #tpu.memory_space<vmem>>, %arg5: memref<3x32xf32, #tpu.memory_space<vmem>>, %arg6: memref<32x32xf32, #tpu.memory_space<vmem>>, %arg7: memref<1x32xf32, #tpu.memory_space<vmem>>, %arg8: memref<8x32xf32, #tpu.memory_space<vmem>>) attributes {dimension_semantics = [], scalar_prefetch = 0 : i64, scratch_operands = 0 : i64, tpu.core_type = #tpu.core_type<tc>} {
    %c0 = arith.constant 0 : index
    %c0_0 = arith.constant 0 : index
    %0 = vector.load %arg0[%c0, %c0_0] : memref<8x24xf32, #tpu.memory_space<vmem>>, vector<8x24xf32>
    %c0_1 = arith.constant 0 : index
    %c0_2 = arith.constant 0 : index
    %1 = vector.load %arg2[%c0_1, %c0_2] : memref<24x32xf32, #tpu.memory_space<vmem>>, vector<24x32xf32>
    %cst = arith.constant dense<0.000000e+00> : vector<8x32xf32>
    %2 = tpu.matmul %0, %1, %cst {dimension_numbers = #tpu.dot_dimension_numbers<[1], [0], [0], [1], [0, 0, 1, 1], [], []>} : vector<8x24xf32>, vector<24x32xf32>, vector<8x32xf32> -> vector<8x32xf32>
    %c0_3 = arith.constant 0 : index
    %c0_4 = arith.constant 0 : index
    %3 = vector.load %arg1[%c0_3, %c0_4] : memref<8x8xf32, #tpu.memory_space<vmem>>, vector<8x8xf32>
    %c0_5 = arith.constant 0 : index
    %c0_6 = arith.constant 0 : index
    %4 = vector.load %arg3[%c0_5, %c0_6] : memref<8x32xf32, #tpu.memory_space<vmem>>, vector<8x32xf32>
    %cst_7 = arith.constant dense<0.000000e+00> : vector<8x32xf32>
    %5 = tpu.matmul %3, %4, %cst_7 {dimension_numbers = #tpu.dot_dimension_numbers<[1], [0], [0], [1], [0, 0, 1, 1], [], []>} : vector<8x8xf32>, vector<8x32xf32>, vector<8x32xf32> -> vector<8x32xf32>
    %6 = arith.addf %2, %5 : vector<8x32xf32>
    %c0_8 = arith.constant 0 : index
    %c0_9 = arith.constant 0 : index
    %7 = vector.load %arg5[%c0_8, %c0_9] : memref<3x32xf32, #tpu.memory_space<vmem>>, vector<1x32xf32>
    %8 = vector.shape_cast %7 : vector<1x32xf32> to vector<32xf32>
    %9 = vector.shape_cast %8 : vector<32xf32> to vector<1x32xf32>
    %10 = vector.broadcast %9 : vector<1x32xf32> to vector<8x32xf32>
    %11 = arith.addf %6, %10 : vector<8x32xf32>
    %cst_10 = arith.constant 0.000000e+00 : f32
    %12 = vector.broadcast %cst_10 : f32 to vector<8x32xf32>
    %13 = arith.maximumf %11, %12 : vector<8x32xf32>
    %c0_11 = arith.constant 0 : index
    %c0_12 = arith.constant 0 : index
    %c0_13 = arith.constant 0 : index
    %14 = vector.load %arg4[%c0_11, %c0_12, %c0_13] : memref<2x32x32xf32, #tpu.memory_space<vmem>>, vector<1x32x32xf32>
    %15 = vector.shape_cast %14 : vector<1x32x32xf32> to vector<32x32xf32>
    %cst_14 = arith.constant dense<0.000000e+00> : vector<8x32xf32>
    %16 = tpu.matmul %13, %15, %cst_14 {dimension_numbers = #tpu.dot_dimension_numbers<[1], [0], [0], [1], [0, 0, 1, 1], [], []>} : vector<8x32xf32>, vector<32x32xf32>, vector<8x32xf32> -> vector<8x32xf32>
    %c1 = arith.constant 1 : index
    %c0_15 = arith.constant 0 : index
    %17 = vector.load %arg5[%c1, %c0_15] : memref<3x32xf32, #tpu.memory_space<vmem>>, vector<1x32xf32>
    %18 = vector.shape_cast %17 : vector<1x32xf32> to vector<32xf32>
    %19 = vector.shape_cast %18 : vector<32xf32> to vector<1x32xf32>
    %20 = vector.broadcast %19 : vector<1x32xf32> to vector<8x32xf32>
    %21 = arith.addf %16, %20 : vector<8x32xf32>
    %cst_16 = arith.constant 0.000000e+00 : f32
    %22 = vector.broadcast %cst_16 : f32 to vector<8x32xf32>
    %23 = arith.maximumf %21, %22 : vector<8x32xf32>
    %c1_17 = arith.constant 1 : index
    %c0_18 = arith.constant 0 : index
    %c0_19 = arith.constant 0 : index
    %24 = vector.load %arg4[%c1_17, %c0_18, %c0_19] : memref<2x32x32xf32, #tpu.memory_space<vmem>>, vector<1x32x32xf32>
    %25 = vector.shape_cast %24 : vector<1x32x32xf32> to vector<32x32xf32>
    %cst_20 = arith.constant dense<0.000000e+00> : vector<8x32xf32>
    %26 = tpu.matmul %23, %25, %cst_20 {dimension_numbers = #tpu.dot_dimension_numbers<[1], [0], [0], [1], [0, 0, 1, 1], [], []>} : vector<8x32xf32>, vector<32x32xf32>, vector<8x32xf32> -> vector<8x32xf32>
    %c2 = arith.constant 2 : index
    %c0_21 = arith.constant 0 : index
    %27 = vector.load %arg5[%c2, %c0_21] : memref<3x32xf32, #tpu.memory_space<vmem>>, vector<1x32xf32>
    %28 = vector.shape_cast %27 : vector<1x32xf32> to vector<32xf32>
    %29 = vector.shape_cast %28 : vector<32xf32> to vector<1x32xf32>
    %30 = vector.broadcast %29 : vector<1x32xf32> to vector<8x32xf32>
    %31 = arith.addf %26, %30 : vector<8x32xf32>
    %cst_22 = arith.constant 0.000000e+00 : f32
    %32 = vector.broadcast %cst_22 : f32 to vector<8x32xf32>
    %33 = arith.maximumf %31, %32 : vector<8x32xf32>
    %c0_23 = arith.constant 0 : index
    %c0_24 = arith.constant 0 : index
    %34 = vector.load %arg6[%c0_23, %c0_24] : memref<32x32xf32, #tpu.memory_space<vmem>>, vector<32x32xf32>
    %cst_25 = arith.constant dense<0.000000e+00> : vector<8x32xf32>
    %35 = tpu.matmul %33, %34, %cst_25 {dimension_numbers = #tpu.dot_dimension_numbers<[1], [0], [0], [1], [0, 0, 1, 1], [], []>} : vector<8x32xf32>, vector<32x32xf32>, vector<8x32xf32> -> vector<8x32xf32>
    %c0_26 = arith.constant 0 : index
    %c0_27 = arith.constant 0 : index
    %36 = vector.load %arg7[%c0_26, %c0_27] : memref<1x32xf32, #tpu.memory_space<vmem>>, vector<1x32xf32>
    %37 = vector.broadcast %36 : vector<1x32xf32> to vector<8x32xf32>
    %38 = arith.addf %35, %37 : vector<8x32xf32>
    %c0_28 = arith.constant 0 : index
    %c0_29 = arith.constant 0 : index
    %39 = vector.load %arg8[%c0_28, %c0_29] : memref<8x32xf32, #tpu.memory_space<vmem>>, vector<8x32xf32>
    tpu.vector_store %arg8[%c0_28, %c0_29], %38 {strides = array<i32>} : memref<8x32xf32, #tpu.memory_space<vmem>>, vector<8x32xf32>,
    return
  }
}

</mosaic_0001>

<bundles_post_ra>
// kernel: tpu_custom_call.1
= control target key start
LH: loop header
LB: loop body
LE: loop exit
PB: predicated region body
PF: predicated region fallthrough
CT: control target
= control target key end

     0   :  { %13 = vsyncpa [#allocation3], 0  ;;  %s577_s0 = inlined_call_operand.hbm [shape: f32[8,24], index: 0, kind: input, shape index: {}]   ;;  %s578_s1 = inlined_call_operand.hbm [shape: f32[8,8], index: 1, kind: input, shape index: {}]   ;;  %s579_s2 = inlined_call_operand.hbm [shape: f32[24,32], index: 2, kind: input, shape index: {}]   ;;  %s580_s3 = inlined_call_operand.hbm [shape: f32[8,32], index: 3, kind: input, shape index: {}]   ;;  %s581_s4 = inlined_call_operand.hbm [shape: f32[2,32,32], index: 4, kind: input, shape index: {}]   ;;  %s582_s5 = inlined_call_operand.vmem [shape: f32[3,32], index: 5, kind: input, shape index: {}]   ;;  %s583_s6 = inlined_call_operand.hbm [shape: f32[32,32], index: 6, kind: input, shape index: {}]   ;;  %s584_s7 = inlined_call_operand.vmem [shape: f32[1,32], index: 7, kind: input, shape index: {}]   ;;  %s585_s8 = inlined_call_operand.hbm [shape: f32[8,32], index: 8, kind: output, shape index: {}]  }
   0x1   :  { %14 = vsyncpa [#allocation6], 0 }
   0x2   :  { %15 = vsyncpa [#allocation9], 0 }
   0x3   :  { %16 = vsyncpa [#allocation12], 0  ;;  %s34_s29 = sshll.u32 %s578_s1, 4  ;;  %s35_s29 = int_to_ptr.hbm [resolvable:$true] %s34_s29 }
   0x4   :  { %17 = vsyncpa [#allocation4], 0  ;;  %s486_s30 = smov [#allocation5]   ;;  %s58_s12 = sshll.u32 %s580_s3, 4  ;;  %s59_s12 = int_to_ptr.hbm [resolvable:$true] %s58_s12 }
   0x5   :  { %s36_s9 = sshll.u32 %s486_s30, 4  ;;  %s487_s13 = smov [#allocation8]   ;;  %s37_s9 = int_to_ptr.vmem [resolvable:$true] %s36_s9 }
   0x6   :  { %39 = dma.hbm_to_vmem [thread:$0]  %s35_s29, 128, %s37_s9, [#allocation6]  }
   0x7   :  { %s60_s14 = sshll.u32 %s487_s13, 4  ;;  %s23_s17 = sshll.u32 %s577_s0, 4  ;;  %s61_s14 = int_to_ptr.vmem [resolvable:$true] %s60_s14  ;;  %s24_s17 = int_to_ptr.hbm [resolvable:$true] %s23_s17 }
   0x8   :  { %63 = dma.hbm_to_vmem [thread:$0]  %s59_s12, 128, %s61_s14, [#allocation9]  }
   0x9   :  { %s44_s19 = sshll.u32 %s579_s2, 4  ;;  %s488_s20 = smov [#allocation2]   ;;  %s45_s19 = int_to_ptr.hbm [resolvable:$true] %s44_s19 }
   0xa   :  { %s25_s21 = sshll.u32 %s488_s20, 4  ;;  %s489_s3 = smov [#allocation7]   ;;  %s26_s21 = int_to_ptr.vmem [resolvable:$true] %s25_s21 }
   0xb   :  { %28 = dma.hbm_to_vmem [thread:$0]  %s24_s17, 128, %s26_s21, [#allocation3]  }
   0xc   :  { %s46_s22 = sshll.u32 %s489_s3, 4  ;;  %s490_s23 = smov 128   ;;  %s47_s22 = int_to_ptr.vmem [resolvable:$true] %s46_s22 }
   0xd   :  { %s491_s24 = smov 8   ;;  %s68_s26 = sshll.u32 %s581_s4, 4  ;;  %s69_s26 = int_to_ptr.hbm [resolvable:$true] %s68_s26 }
   0xe   :  { %52 = dma.hbm_to_vmem [thread:$0]  %s45_s19, 384, %s47_s22, [#allocation6], %s490_s23, %s490_s23, %s491_s24  }
   0xf   :  { %s492_s27 = smov [#allocation10]   ;;  %s83_s30 = sshll.u32 %s583_s6, 4  ;;  %s84_s30 = int_to_ptr.hbm [resolvable:$true] %s83_s30 }
  0x10   :  { %s70_s28 = sshll.u32 %s492_s27, 4  ;;  %s493_s9 = smov [#allocation11]   ;;  %s71_s28 = int_to_ptr.vmem [resolvable:$true] %s70_s28 }
  0x11   :  { %76 = dma.hbm_to_vmem [thread:$0]  %s69_s26, 1024, %s71_s28, [#allocation9], %s490_s23, %s490_s23, %s491_s24  }
  0x12   :  { %s85_s10 = sshll.u32 %s493_s9, 4  ;;  %s86_s10 = int_to_ptr.vmem [resolvable:$true] %s85_s10 }
  0x13   :  { %91 = dma.hbm_to_vmem [thread:$0]  %s84_s30, 512, %s86_s10, [#allocation12], %s490_s23, %s490_s23, %s491_s24  }
  0x14   :  { %476 = dma.done.wait [#allocation3], 128  }
  0x15   :  { %477 = vsyncadd [#allocation3], 4294967168 }
  0x16   :  { %478 = dma.done.wait [#allocation6], 512  }
  0x17   :  { %479 = vsyncadd [#allocation6], 4294966784 }
  0x18   :  { %480 = dma.done.wait [#allocation9], 1152  }
  0x19   :  { %481 = vsyncadd [#allocation9], 4294966144 }
  0x1a   :  { %482 = dma.done.wait [#allocation12], 512  }
  0x1b   :  { %483 = vsyncadd [#allocation12], 4294966784  ;;  %vm124_vm0 = vcmask 64512   ;;  %v121_v0 = vld [vmem:[#allocation7 + $0x10] sm:$0xff]  ;;  %v120_v1 = vld [vmem:[#allocation7 + $0x8] sm:$0xff]  ;;  %vm148_vm1 = vcmask 195584  }
  0x1c   :  { %v123_v2 = vld [vmem:[#allocation8] sm:$0xff]  ;;  %165 = vmatpush.msra.mxu1 %v121_v0  ;;  %v119_v3 = vld [vmem:[#allocation7] sm:$0xff]  ;;  %v118_v5 = vld [vmem:[#allocation2] sm:$0xff]  ;;  %vm182_vm2 = vcmask 261120   ;;  %s494_s17 = smov [#allocation13]   ;;  %s277_s20 = sshll.u32 %s585_s8, 4  ;;  %s278_s20 = int_to_ptr.hbm [resolvable:$true] %s277_s20 }
  0x1d   :  { %143 = vmatpush.msra.mxu0 %v123_v2  ;;  %v122_v4 = vld [vmem:[#allocation5] sm:$0xff]  ;;  %v178_v7 = vld [vmem:[#allocation10 + $0x10] sm:$0xff]  ;;  %v177_v8 = vld [vmem:[#allocation10 + $0x8] sm:$0xff]  ;;  %s275_s1 = sshll.u32 %s494_s17, 4  ;;  %s276_s1 = int_to_ptr.vmem [resolvable:$true] %s275_s1 }
  0x1e   :  { %290 = vmatmul.msk.f32.vlgmr.msra.gmra.mxu0 %vm124_vm0, %v122_v4  ;;  %166 = vmatpush.msra.mxu1 %v120_v1  ;;  %v179_v6 = vld [vmem:[#allocation10 + $0x18] sm:$0xff]  ;;  %v176_v9 = vld [vmem:[#allocation10] sm:$0xff]  ;;  %v304_v12 = vld [vmem:[%s582_s5] ss:$0 sm:$0xff] }
  0x1f   :  { %198 = vmatpush.msra.mxu2 %v179_v6  ;;  %v211_v10 = vld [vmem:[#allocation10 + $0x38] sm:$0xff]  ;;  %v210_v17 = vld [vmem:[#allocation10 + $0x30] sm:$0xff]  ;;  %v209_v18 = vld [vmem:[#allocation10 + $0x28] sm:$0xff] }
  0x20   :  { %167 = vmatpush.msra.mxu1 %v119_v3  ;;  %229 = vmatpush.msra.mxu3 %v211_v10  ;;  %v208_v19 = vld [vmem:[#allocation10 + $0x20] sm:$0xff]  ;;  %v241_v20 = vld [vmem:[#allocation11 + $0x18] sm:$0xff]  ;;  %v240_v21 = vld [vmem:[#allocation11 + $0x10] sm:$0xff] }
  0x21   :  { %291 = vmatmul.msk.f32.vlgmr.msra.gmra.mxu1 %vm148_vm1, %v118_v5  ;;  %199 = vmatpush.msra.mxu2 %v178_v7  ;;  %v305_v22 = vld [vmem:[%s582_s5 + $0x1] ss:$0 sm:$0xff]  ;;  %v239_v26 = vld [vmem:[#allocation11 + $0x8] sm:$0xff]  ;;  %v238_v27 = vld [vmem:[#allocation11] sm:$0xff] }
  0x22   :  { %230 = vmatpush.msra.mxu3 %v210_v17  ;;  %261 = vmatpush.msrb.mxu0 %v241_v20  ;;  %v306_v28 = vld [vmem:[%s582_s5 + $0x2] ss:$0 sm:$0xff]  ;;  %v307_v32 = vld [vmem:[%s584_s7] ss:$0 sm:$0xff] }
  0x23   :  { %200 = vmatpush.msra.mxu2 %v177_v8 }
  0x24   :  { %231 = vmatpush.msra.mxu3 %v209_v18  ;;  %262 = vmatpush.msrb.mxu0 %v240_v21 }
  0x25   :  { %201 = vmatpush.msra.mxu2 %v176_v9 }
  0x26   :  { %232 = vmatpush.msra.mxu3 %v208_v19  ;;  %263 = vmatpush.msrb.mxu0 %v239_v26 }
  0x28   :  { %264 = vmatpush.msrb.mxu0 %v238_v27 }
  0x9b   :  { %v145_v11 = vpop.f32.mrf.mxu0 }
  0x9e   :  { %v169_v13 = vpop.f32.mrf.mxu1 }
  0x9f   :  { %v170_v14 = vadd.f32 %v169_v13, %v145_v11 }
  0xa1   :  { %v174_v15 = vadd.f32 %v304_v12, %v170_v14 }
  0xa3   :  { %v175_v16 = vmax.f32 %v174_v15, 0.0 }
  0xa5   :  { %292 = vmatmul.msk.f32.vlgmr.msra.gmra.mxu2 %vm182_vm2, %v175_v16 }
 0x128   :  { %v203_v23 = vpop.f32.mrf.mxu2 }
 0x129   :  { %v204_v24 = vadd.f32 %v305_v22, %v203_v23 }
 0x12b   :  { %v206_v25 = vmax.f32 %v204_v24, 0.0 }
 0x12d   :  { %293 = vmatmul.msk.f32.vlgmr.msra.gmra.mxu3 %vm182_vm2, %v206_v25 }
 0x1b0   :  { %v234_v29 = vpop.f32.mrf.mxu3 }
 0x1b1   :  { %v235_v30 = vadd.f32 %v306_v28, %v234_v29 }
 0x1b3   :  { %v237_v31 = vmax.f32 %v235_v30, 0.0 }
 0x1b5   :  { %294 = vmatmul.msk.f32.vlgmr.msrb.gmra.mxu0 %vm182_vm2, %v237_v31 }
 0x232   :  { %v266_v33 = vpop.f32.mrf.mxu0 }
 0x233   :  { %v267_v34 = vadd.f32 %v307_v32, %v266_v33 }
 0x235   :  { %269 = vst.msk [vmem:[#allocation13] sm:$0xff] %vm182_vm2, %v267_v34 }
 0x236   :  { %280 = dma.vmem_to_hbm [thread:$0]  %s276_s1, 128, %s278_s20, [#allocation4]  }
 0x237   :  { %484 = dma.done.wait [#allocation4], 128  }
 0x238   :  { %485 = vsyncadd [#allocation4], 4294967168 }
 0x239   :  { %285 = vsyncpa [#allocation3], 1 }
 0x23a   :  { %286 = vsyncpa [#allocation6], 1 }
 0x23b   :  { %287 = vsyncpa [#allocation9], 1 }
 0x23c   :  { %288 = vsyncpa [#allocation12], 1 }
 0x23d   :  { %289 = vsyncpa [#allocation4], 1 }

</bundles_post_ra>
